<compile_context>
chip_gen: v7x
topology: tpu7x:2x2x1
jax: 0.10.0
libtpu: 0.0.40
codegen_flags: <defaults>
</compile_context>

<pallas_src>
import functools

import jax
import jax.numpy as jnp
from jax.experimental import pallas as pl
from jax.experimental.pallas import tpu as pltpu


# ------------------------------ fused kernel ------------------------------

def _fused_mlp_kernel(*refs, n_layers):
    """Entire BranchingNet forward on one (TB, .) batch tile.

    After host-side weight fusion the network is a single MLP chain:
      refs = x, (w, b) * n_layers, out
    Weights are bf16 (in, out); biases are f32 (1, out).  All layers but the
    last are Linear+ReLU; the last is Linear (centering + value-add already
    folded into its weights).
    """
    it = iter(refs)
    x_ref = next(it)
    layers = [(next(it), next(it)) for _ in range(n_layers)]
    o_ref = next(it)

    x = x_ref[...]
    for li, (w_ref, b_ref) in enumerate(layers):
        w = w_ref[...]
        y = jnp.dot(x.astype(w.dtype), w,
                    preferred_element_type=jnp.float32) + b_ref[...]
        x = jnp.maximum(y, 0.0) if li + 1 < n_layers else y
    o_ref[...] = x.astype(o_ref.dtype)


# --------------------------- parameters ---------------------------

def _init_linear(key, din, dout):
    """Deterministic PyTorch-nn.Linear-style init (uniform +/- 1/sqrt(fan_in))."""
    kw, kb = jax.random.split(key)
    bound = 1.0 / float(din) ** 0.5
    w = jax.random.uniform(kw, (din, dout), jnp.float32, -bound, bound)
    b = jax.random.uniform(kb, (dout,), jnp.float32, -bound, bound)
    return w, b


def _block_diag(mats):
    rows = sum(m.shape[0] for m in mats)
    cols = sum(m.shape[1] for m in mats)
    out = jnp.zeros((rows, cols), jnp.float32)
    r = c = 0
    for m in mats:
        out = out.at[r:r + m.shape[0], c:c + m.shape[1]].set(m)
        r += m.shape[0]
        c += m.shape[1]
    return out


def _round_up(x, m):
    return -(-x // m) * m


def _build_fused_params(params):
    """Pre-fuse (host-side, once):
       * value + branch MLPs into one chain of wide matmuls,
       * per-branch mean-centering (x @ (I - J/A)) into the last-layer weights,
       * the value broadcast-add into the last-layer weights (Wv tiled over N*A cols),
       * output columns padded to a multiple of 128 for lane-dense stores,
       * weights cast to bf16 for the MXU (biases stay f32)."""
    N = params["num_branches"]
    A = params["action_per_branch"]
    NA = N * A
    NA_pad = _round_up(NA, 128)

    # centering matrix: scores @ (I - J/A) == scores - mean(scores, axis=-1, keepdims)
    c_a = jnp.eye(A, dtype=jnp.float32) - jnp.full((A, A), 1.0 / A, jnp.float32)

    layers = []
    for w, b in params["common"]:
        layers.append((w, b.reshape(1, -1)))

    value = params["value"]        # list of (w (din,dout), b (dout,)), last dout == 1
    branches = params["branches"]  # list of (ws (N,din,dout), bs (N,dout))
    l_val = len(value) - 1
    l_br = len(branches) - 1
    if l_val != l_br:
        # TODO(synk): unequal value/action hidden depths need separate in-kernel chains;
        # only the equal-depth (including both-empty) case is fused here.
        raise NotImplementedError("value_hidden and action_hidden depths must match")

    # fused hidden layers: combined activation = [value_hidden | branch0 | ... | branchN-1]
    for i in range(l_br):
        wv, bv = value[i]
        ws, bs = branches[i]
        mats = [wv] + [ws[n] for n in range(N)]
        if i == 0:   # all chains consume common_out -> concat along output dim
            w_f = jnp.concatenate(mats, axis=1)
        else:        # chains are independent -> block diagonal
            w_f = _block_diag(mats)
        b_f = jnp.concatenate([bv] + [bs[n] for n in range(N)], axis=0).reshape(1, -1)
        layers.append((w_f, b_f))

    # final layer: value head replicated over all N*A columns + centered branch heads
    wv, bv = value[-1]             # (Hv, 1), (1,)
    ws, bs = branches[-1]          # (N, Hb, A), (N, A)
    w_val = jnp.tile(wv, (1, NA))                                   # (Hv, NA)
    w_br_blocks = [ws[n] @ c_a for n in range(N)]                   # each (Hb, A)
    b_br = jnp.concatenate([bs[n] @ c_a for n in range(N)], axis=0) # (NA,)
    if l_br == 0:  # both heads consume common_out directly -> contributions sum
        w_f = w_val + jnp.concatenate(w_br_blocks, axis=1)
    else:
        w_f = jnp.concatenate([w_val, _block_diag(w_br_blocks)], axis=0)
    b_f = (jnp.tile(bv, NA) + b_br).reshape(1, -1)
    if NA_pad != NA:  # lane-dense output: pad columns with zeros, slice in wrapper
        w_f = jnp.pad(w_f, ((0, 0), (0, NA_pad - NA)))
        b_f = jnp.pad(b_f, ((0, 0), (0, NA_pad - NA)))
    layers.append((w_f, b_f))

    # bf16 weights for the MXU; biases / accumulation stay f32.
    layers = [(w.astype(jnp.bfloat16), b.astype(jnp.float32)) for w, b in layers]
    return {"layers": layers, "na_pad": NA_pad}


def make_branching_net_params(key, state_dim, num_branches, action_per_branch,
                              common_hidden, value_hidden, action_hidden):
    keys = iter(jax.random.split(key, 128))

    # common MLP: output_dim=0 -> Linear+ReLU per hidden size, no final linear.
    common = []
    din = state_dim
    for h in common_hidden:
        common.append(_init_linear(next(keys), din, h))
        din = h
    common_out_dim = din

    # value MLP: hidden Linear+ReLU, then final Linear -> 1.
    value = []
    din = common_out_dim
    for h in value_hidden:
        value.append(_init_linear(next(keys), din, h))
        din = h
    value.append(_init_linear(next(keys), din, 1))

    # branch MLPs stored per-layer, stacked across branches.
    branch_layer_dims = []
    din = common_out_dim
    for h in action_hidden:
        branch_layer_dims.append((din, h))
        din = h
    branch_layer_dims.append((din, action_per_branch))

    branches = []
    for (d_in, d_out) in branch_layer_dims:
        ws, bs = [], []
        for _ in range(num_branches):
            w, b = _init_linear(next(keys), d_in, d_out)
            ws.append(w)
            bs.append(b)
        branches.append((jnp.stack(ws, 0), jnp.stack(bs, 0)))

    params = {
        "common": common,
        "value": value,
        "branches": branches,
        "num_branches": num_branches,
        "action_per_branch": action_per_branch,
    }
    params["fused"] = _build_fused_params(params)
    return params


# ------------------------------ wrapper ------------------------------

def branching_net_forward(params, obs):
    """obs: (B, *state_shape) -> logits (B, num_branches, action_per_branch)."""
    B = obs.shape[0]
    x = obs.reshape(B, -1).astype(jnp.float32)
    din = x.shape[1]
    N = params["num_branches"]
    A = params["action_per_branch"]
    NA = N * A
    fused = params["fused"]
    layers = fused["layers"]
    NA_pad = fused["na_pad"]
    n_layers = len(layers)

    # Batch tile: big tiles (up to 1024 rows) for pipeline efficiency, but at least 2 grid
    # steps whenever B > 8 so the "parallel" axis can shard across v7x's two TensorCores.
    TB = min(1024, max(8, _round_up(-(-B // 2), 8)))
    Bp = _round_up(B, TB)
    if Bp != B:
        x = jnp.pad(x, ((0, Bp - B), (0, 0)))

    inputs = [x]
    specs = [pl.BlockSpec((TB, din), lambda i: (i, 0))]
    for w, b in layers:
        for arr in (w, b):
            inputs.append(arr)
            specs.append(pl.BlockSpec(arr.shape, lambda i: (0, 0)))  # grid-invariant

    # advisory cost estimate for XLA's scheduler
    flops = sum(2 * Bp * int(w.shape[0]) * int(w.shape[1]) for w, _ in layers)
    bytes_accessed = (int(x.size) * 4
                      + sum(int(w.size) * w.dtype.itemsize + int(b.size) * 4
                            for w, b in layers)
                      + Bp * NA_pad * 4)
    cost = pl.CostEstimate(flops=flops, transcendentals=0,
                           bytes_accessed=int(bytes_accessed))

    out = pl.pallas_call(
        functools.partial(_fused_mlp_kernel, n_layers=n_layers),
        out_shape=jax.ShapeDtypeStruct((Bp, NA_pad), jnp.float32),
        grid=(Bp // TB,),
        in_specs=specs,
        out_specs=pl.BlockSpec((TB, NA_pad), lambda i: (i, 0)),
        compiler_params=pltpu.CompilerParams(dimension_semantics=("parallel",)),
        cost_estimate=cost,
    )(*inputs)

    # lane-dense (Bp, NA_pad) slab -> (B, N, A); matches torch.stack(action_out, 1) layout.
    return out[:B, :NA].reshape(B, N, A)


# ------------------------------ pure-JAX reference ------------------------------

def _ref_forward(params, obs):
    x = obs.reshape(obs.shape[0], -1).astype(jnp.float32)
    for w, b in params["common"]:
        x = jnp.maximum(x @ w + b, 0.0)
    common_out = x

    v = common_out
    for w, b in params["value"][:-1]:
        v = jnp.maximum(v @ w + b, 0.0)
    wv, bv = params["value"][-1]
    v = v @ wv + bv                                    # (B, 1)
    value_out = v[:, None, :]                          # (B, 1, 1)

    outs = []
    nb = len(params["branches"])
    for n in range(params["num_branches"]):
        h = common_out
        for li, (ws, bs) in enumerate(params["branches"]):
            h = h @ ws[n] + bs[n]
            if li + 1 < nb:
                h = jnp.maximum(h, 0.0)
        outs.append(h)
    action_scores = jnp.stack(outs, 1)                 # (B, N, A)
    action_scores = action_scores - jnp.mean(action_scores, axis=2, keepdims=True)
    return value_out + action_scores


# ----------------------------------- main -----------------------------------

if __name__ == "__main__":
    key = jax.random.PRNGKey(0)
    k_params, k_obs = jax.random.split(key)

    # Small config consistent with BranchingNet.__init__:
    state_shape = (4, 16)          # flattened to 64 inside the MLP
    num_branches = 3
    action_per_branch = 4
    common_hidden = [32, 32]
    value_hidden = [32]
    action_hidden = [32]
    batch = 2

    state_dim = 1
    for d in state_shape:
        state_dim *= d

    params = make_branching_net_params(
        k_params, state_dim, num_branches, action_per_branch,
        common_hidden, value_hidden, action_hidden)

    obs = jax.random.normal(k_obs, (batch,) + state_shape, jnp.float32)

    logits = jax.block_until_ready(branching_net_forward(params, obs))
    assert logits.shape == (batch, num_branches, action_per_branch), logits.shape

    ref = jax.block_until_ready(_ref_forward(params, obs))
    # bf16 matmul operands (f32 accumulate) vs the pure-f32 reference => loosened tolerance.
    assert jnp.allclose(logits, ref, rtol=2e-2, atol=2e-2), (
        float(jnp.max(jnp.abs(logits - ref))))

    print("KERNEL_OK")
</pallas_src>

<mosaic_0001>
module attributes {stable_mosaic.version = 11 : i64} {
  func.func @_fused_mlp_kernel(%arg0: i32, %arg1: memref<8x64xf32, #tpu.memory_space<vmem>>, %arg2: memref<64x32xbf16, #tpu.memory_space<vmem>>, %arg3: memref<1x32xf32, #tpu.memory_space<vmem>>, %arg4: memref<32x32xbf16, #tpu.memory_space<vmem>>, %arg5: memref<1x32xf32, #tpu.memory_space<vmem>>, %arg6: memref<32x128xbf16, #tpu.memory_space<vmem>>, %arg7: memref<1x128xf32, #tpu.memory_space<vmem>>, %arg8: memref<128x128xbf16, #tpu.memory_space<vmem>>, %arg9: memref<1x128xf32, #tpu.memory_space<vmem>>, %arg10: memref<8x128xf32, #tpu.memory_space<vmem>>) attributes {dimension_semantics = [#tpu.dimension_semantics<parallel>], iteration_bounds = array<i64: 1>, scalar_prefetch = 0 : i64, scratch_operands = 0 : i64, tpu.core_type = #tpu.core_type<tc>, window_params = [{transform_indices = @transform_0, window_bounds = array<i64: 8, 64>}, {pipeline_mode = #tpu.pipeline_mode<synchronous>, transform_indices = @transform_1, window_bounds = array<i64: 64, 32>}, {pipeline_mode = #tpu.pipeline_mode<synchronous>, transform_indices = @transform_2, window_bounds = array<i64: 1, 32>}, {pipeline_mode = #tpu.pipeline_mode<synchronous>, transform_indices = @transform_3, window_bounds = array<i64: 32, 32>}, {pipeline_mode = #tpu.pipeline_mode<synchronous>, transform_indices = @transform_4, window_bounds = array<i64: 1, 32>}, {pipeline_mode = #tpu.pipeline_mode<synchronous>, transform_indices = @transform_5, window_bounds = array<i64: 32, 128>}, {pipeline_mode = #tpu.pipeline_mode<synchronous>, transform_indices = @transform_6, window_bounds = array<i64: 1, 128>}, {pipeline_mode = #tpu.pipeline_mode<synchronous>, transform_indices = @transform_7, window_bounds = array<i64: 128, 128>}, {pipeline_mode = #tpu.pipeline_mode<synchronous>, transform_indices = @transform_8, window_bounds = array<i64: 1, 128>}, {transform_indices = @transform_9, window_bounds = array<i64: 8, 128>}]} {
    %c0 = arith.constant 0 : index
    %c0_0 = arith.constant 0 : index
    %0 = vector.load %arg1[%c0, %c0_0] : memref<8x64xf32, #tpu.memory_space<vmem>>, vector<8x64xf32>
    %c0_1 = arith.constant 0 : index
    %c0_2 = arith.constant 0 : index
    %1 = vector.load %arg2[%c0_1, %c0_2] : memref<64x32xbf16, #tpu.memory_space<vmem>>, vector<64x32xbf16>
    %2 = arith.truncf %0 : vector<8x64xf32> to vector<8x64xbf16>
    %cst = arith.constant dense<0.000000e+00> : vector<8x32xf32>
    %3 = tpu.matmul %2, %1, %cst {dimension_numbers = #tpu.dot_dimension_numbers<[1], [0], [0], [1], [0, 0, 1, 1], [], []>} : vector<8x64xbf16>, vector<64x32xbf16>, vector<8x32xf32> -> vector<8x32xf32>
    %c0_3 = arith.constant 0 : index
    %c0_4 = arith.constant 0 : index
    %4 = vector.load %arg3[%c0_3, %c0_4] : memref<1x32xf32, #tpu.memory_space<vmem>>, vector<1x32xf32>
    %5 = vector.broadcast %4 : vector<1x32xf32> to vector<8x32xf32>
    %6 = arith.addf %3, %5 : vector<8x32xf32>
    %cst_5 = arith.constant 0.000000e+00 : f32
    %7 = vector.broadcast %cst_5 : f32 to vector<8x32xf32>
    %8 = arith.maximumf %6, %7 : vector<8x32xf32>
    %c0_6 = arith.constant 0 : index
    %c0_7 = arith.constant 0 : index
    %9 = vector.load %arg4[%c0_6, %c0_7] : memref<32x32xbf16, #tpu.memory_space<vmem>>, vector<32x32xbf16>
    %10 = arith.truncf %8 : vector<8x32xf32> to vector<8x32xbf16>
    %cst_8 = arith.constant dense<0.000000e+00> : vector<8x32xf32>
    %11 = tpu.matmul %10, %9, %cst_8 {dimension_numbers = #tpu.dot_dimension_numbers<[1], [0], [0], [1], [0, 0, 1, 1], [], []>} : vector<8x32xbf16>, vector<32x32xbf16>, vector<8x32xf32> -> vector<8x32xf32>
    %c0_9 = arith.constant 0 : index
    %c0_10 = arith.constant 0 : index
    %12 = vector.load %arg5[%c0_9, %c0_10] : memref<1x32xf32, #tpu.memory_space<vmem>>, vector<1x32xf32>
    %13 = vector.broadcast %12 : vector<1x32xf32> to vector<8x32xf32>
    %14 = arith.addf %11, %13 : vector<8x32xf32>
    %cst_11 = arith.constant 0.000000e+00 : f32
    %15 = vector.broadcast %cst_11 : f32 to vector<8x32xf32>
    %16 = arith.maximumf %14, %15 : vector<8x32xf32>
    %c0_12 = arith.constant 0 : index
    %c0_13 = arith.constant 0 : index
    %17 = vector.load %arg6[%c0_12, %c0_13] : memref<32x128xbf16, #tpu.memory_space<vmem>>, vector<32x128xbf16>
    %18 = arith.truncf %16 : vector<8x32xf32> to vector<8x32xbf16>
    %cst_14 = arith.constant dense<0.000000e+00> : vector<8x128xf32>
    %19 = tpu.matmul %18, %17, %cst_14 {dimension_numbers = #tpu.dot_dimension_numbers<[1], [0], [0], [1], [0, 0, 1, 1], [], []>} : vector<8x32xbf16>, vector<32x128xbf16>, vector<8x128xf32> -> vector<8x128xf32>
    %c0_15 = arith.constant 0 : index
    %c0_16 = arith.constant 0 : index
    %20 = vector.load %arg7[%c0_15, %c0_16] : memref<1x128xf32, #tpu.memory_space<vmem>>, vector<1x128xf32>
    %21 = vector.broadcast %20 : vector<1x128xf32> to vector<8x128xf32>
    %22 = arith.addf %19, %21 : vector<8x128xf32>
    %cst_17 = arith.constant 0.000000e+00 : f32
    %23 = vector.broadcast %cst_17 : f32 to vector<8x128xf32>
    %24 = arith.maximumf %22, %23 : vector<8x128xf32>
    %c0_18 = arith.constant 0 : index
    %c0_19 = arith.constant 0 : index
    %25 = vector.load %arg8[%c0_18, %c0_19] : memref<128x128xbf16, #tpu.memory_space<vmem>>, vector<128x128xbf16>
    %26 = arith.truncf %24 : vector<8x128xf32> to vector<8x128xbf16>
    %cst_20 = arith.constant dense<0.000000e+00> : vector<8x128xf32>
    %27 = tpu.matmul %26, %25, %cst_20 {dimension_numbers = #tpu.dot_dimension_numbers<[1], [0], [0], [1], [0, 0, 1, 1], [], []>} : vector<8x128xbf16>, vector<128x128xbf16>, vector<8x128xf32> -> vector<8x128xf32>
    %c0_21 = arith.constant 0 : index
    %c0_22 = arith.constant 0 : index
    %28 = vector.load %arg9[%c0_21, %c0_22] : memref<1x128xf32, #tpu.memory_space<vmem>>, vector<1x128xf32>
    %29 = vector.broadcast %28 : vector<1x128xf32> to vector<8x128xf32>
    %30 = arith.addf %27, %29 : vector<8x128xf32>
    %c0_23 = arith.constant 0 : index
    %c0_24 = arith.constant 0 : index
    %31 = vector.load %arg10[%c0_23, %c0_24] : memref<8x128xf32, #tpu.memory_space<vmem>>, vector<8x128xf32>
    tpu.vector_store %arg10[%c0_23, %c0_24], %30 {strides = array<i32>} : memref<8x128xf32, #tpu.memory_space<vmem>>, vector<8x128xf32>,
    return
  }
  func.func @transform_0(%arg0: i32) -> (i32, i32) {
    %c0_i32 = arith.constant 0 : i32
    %c0_i32_0 = arith.constant 0 : i32
    return %arg0, %c0_i32 : i32, i32
  }
  func.func @transform_1(%arg0: i32) -> (i32, i32) {
    %c0_i32 = arith.constant 0 : i32
    %c0_i32_0 = arith.constant 0 : i32
    %c0_i32_1 = arith.constant 0 : i32
    return %c0_i32, %c0_i32_0 : i32, i32
  }
  func.func @transform_2(%arg0: i32) -> (i32, i32) {
    %c0_i32 = arith.constant 0 : i32
    %c0_i32_0 = arith.constant 0 : i32
    %c0_i32_1 = arith.constant 0 : i32
    return %c0_i32, %c0_i32_0 : i32, i32
  }
  func.func @transform_3(%arg0: i32) -> (i32, i32) {
    %c0_i32 = arith.constant 0 : i32
    %c0_i32_0 = arith.constant 0 : i32
    %c0_i32_1 = arith.constant 0 : i32
    return %c0_i32, %c0_i32_0 : i32, i32
  }
  func.func @transform_4(%arg0: i32) -> (i32, i32) {
    %c0_i32 = arith.constant 0 : i32
    %c0_i32_0 = arith.constant 0 : i32
    %c0_i32_1 = arith.constant 0 : i32
    return %c0_i32, %c0_i32_0 : i32, i32
  }
  func.func @transform_5(%arg0: i32) -> (i32, i32) {
    %c0_i32 = arith.constant 0 : i32
    %c0_i32_0 = arith.constant 0 : i32
    %c0_i32_1 = arith.constant 0 : i32
    return %c0_i32, %c0_i32_0 : i32, i32
  }
  func.func @transform_6(%arg0: i32) -> (i32, i32) {
    %c0_i32 = arith.constant 0 : i32
    %c0_i32_0 = arith.constant 0 : i32
    %c0_i32_1 = arith.constant 0 : i32
    return %c0_i32, %c0_i32_0 : i32, i32
  }
  func.func @transform_7(%arg0: i32) -> (i32, i32) {
    %c0_i32 = arith.constant 0 : i32
    %c0_i32_0 = arith.constant 0 : i32
    %c0_i32_1 = arith.constant 0 : i32
    return %c0_i32, %c0_i32_0 : i32, i32
  }
  func.func @transform_8(%arg0: i32) -> (i32, i32) {
    %c0_i32 = arith.constant 0 : i32
    %c0_i32_0 = arith.constant 0 : i32
    %c0_i32_1 = arith.constant 0 : i32
    return %c0_i32, %c0_i32_0 : i32, i32
  }
  func.func @transform_9(%arg0: i32) -> (i32, i32) {
    %c0_i32 = arith.constant 0 : i32
    %c0_i32_0 = arith.constant 0 : i32
    return %arg0, %c0_i32 : i32, i32
  }
}

</mosaic_0001>

<bundles_post_ra>
// kernel: tpu_custom_call.1
= control target key start
LH: loop header
LB: loop body
LE: loop exit
PB: predicated region body
PF: predicated region fallthrough
CT: control target
= control target key end

     0   :  { %14 = vsyncpa [#allocation3], 0  ;;  %s821_s0 = inlined_call_operand.vmem [shape: f32[8,64], index: 0, kind: input, shape index: {}]   ;;  %s822_s1 = inlined_call_operand.vmem [shape: bf16[64,32], index: 1, kind: input, shape index: {}]   ;;  %s823_s2 = inlined_call_operand.vmem [shape: f32[1,32], index: 2, kind: input, shape index: {}]   ;;  %s824_s3 = inlined_call_operand.hbm [shape: bf16[32,32], index: 3, kind: input, shape index: {}]   ;;  %s825_s4 = inlined_call_operand.vmem [shape: f32[1,32], index: 4, kind: input, shape index: {}]   ;;  %s826_s5 = inlined_call_operand.hbm [shape: bf16[32,128], index: 5, kind: input, shape index: {}]   ;;  %s827_s6 = inlined_call_operand.hbm [shape: f32[1,128], index: 6, kind: input, shape index: {}]   ;;  %s828_s7 = inlined_call_operand.vmem [shape: bf16[128,128], index: 7, kind: input, shape index: {}]   ;;  %s829_s8 = inlined_call_operand.vmem [shape: f32[1,128], index: 8, kind: input, shape index: {}]   ;;  %s830_s9 = inlined_call_operand.hbm [shape: f32[8,128], index: 9, kind: output, shape index: {}]  }
   0x1   :  { %15 = vsyncpa [#allocation6], 0 }
   0x2   :  { %16 = vsyncpa [#allocation4], 0  ;;  %s634_s30 = smov [#allocation5]   ;;  %s635_s11 = smov [#allocation2]  }
   0x3   :  { %s42_s10 = sshll.u32 %s634_s30, 4  ;;  %s28_s12 = sshll.u32 %s635_s11, 4  ;;  %s43_s10 = int_to_ptr.vmem [resolvable:$true] %s42_s10  ;;  %s692_s12 = int_to_ptr.vmem [resolvable:$true] %s28_s12 }
   0x4   :  { %s540_s15 = scalar_lea.hbm %s826_s5, 256 }
   0x5   :  { %p541_p0 = scmp.ne.s32.totalorder %s826_s5, %s540_s15  ;;  %p544_p1 = scmp.lt.u32.totalorder %s540_s15, %s826_s5 }
   0x7   :  { %p546_p2 = pnand %p544_p1, %p541_p0 }
   0x9   :  { %549 = shalt.err (!%p546_p2)
}
   0xa   :  { %s550_s20 = scalar_lea.vmem %s43_s10, 256  ;;  %p555_p4 = scmp.lt.s32.totalorder %s43_s10, %s43_s10 }
   0xb   :  { %p551_p3 = scmp.ne.s32.totalorder %s43_s10, %s550_s20  ;;  %p556_p5 = scmp.lt.s32.totalorder %s550_s20, %s550_s20 }
   0xd   :  { %p557_p6 = por %p556_p5, %p555_p4 }
   0xf   :  { %p558_p7 = pnand %p557_p6, %p551_p3 }
  0x11   :  { %561 = shalt.err (!%p558_p7)
}
  0x12   :  { %s636_s21 = smov 64   ;;  %s637_s22 = smov 4  }
  0x13   :  { %48 = dma.hbm_to_vmem [thread:$0]  %s826_s5, 256, %s43_s10, [#allocation6], %s636_s21, %s636_s21, %s637_s22  }
  0x14   :  { %s562_s27 = scalar_lea.hbm %s824_s3, 256 }
  0x15   :  { %p563_p8 = scmp.ne.s32.totalorder %s824_s3, %s562_s27  ;;  %p566_p9 = scmp.lt.u32.totalorder %s562_s27, %s824_s3 }
  0x17   :  { %p568_p10 = pnand %p566_p9, %p563_p8 }
  0x19   :  { %571 = shalt.err (!%p568_p10)
}
  0x1a   :  { %s572_s13 = scalar_lea.vmem %s692_s12, 256  ;;  %p577_p12 = scmp.lt.s32.totalorder %s692_s12, %s692_s12 }
  0x1b   :  { %p573_p11 = scmp.ne.s32.totalorder %s692_s12, %s572_s13  ;;  %p578_p13 = scmp.lt.s32.totalorder %s572_s13, %s572_s13 }
  0x1d   :  { %p579_p0 = por %p578_p13, %p577_p12 }
  0x1f   :  { %p580_p1 = pnand %p579_p0, %p573_p11 }
  0x21   :  { %583 = shalt.err (!%p580_p1)
}
  0x22   :  { %34 = dma.hbm_to_vmem [thread:$0]  %s824_s3, 256, %s692_s12, [#allocation3], %s636_s21, %s636_s21, %s637_s22  }
  0x23   :  { %s638_s14 = smov [#allocation7]   ;;  %s584_s18 = scalar_lea.hbm %s827_s6, 16 }
  0x24   :  { %s55_s15 = sshll.u32 %s638_s14, 4  ;;  %p585_p2 = scmp.ne.s32.totalorder %s827_s6, %s584_s18  ;;  %s56_s15 = int_to_ptr.vmem [resolvable:$true] %s55_s15 }
  0x25   :  { %p588_p3 = scmp.lt.u32.totalorder %s584_s18, %s827_s6 }
  0x27   :  { %p590_p4 = pnand %p588_p3, %p585_p2 }
  0x29   :  { %593 = shalt.err (!%p590_p4)
}
  0x2a   :  { %s594_s25 = scalar_lea.vmem %s56_s15, 16  ;;  %s598_s3 = scalar_lea.vmem %s56_s15, 32 }
  0x2b   :  { %p595_p5 = scmp.ne.s32.totalorder %s56_s15, %s594_s25  ;;  %p599_p6 = scmp.lt.s32.totalorder %s56_s15, %s56_s15 }
  0x2c   :  { %p600_p7 = scmp.lt.s32.totalorder %s598_s3, %s594_s25 }
  0x2e   :  { %p601_p8 = por %p600_p7, %p599_p6 }
  0x30   :  { %p602_p9 = pnand %p601_p8, %p595_p5 }
  0x32   :  { %605 = shalt.err (!%p602_p9)
}
  0x33   :  { %58 = dma.hbm_to_vmem [thread:$0]  %s827_s6, 16, %s56_s15, [#allocation6]  }
  0x34   :  { %628 = dma.done.wait [#allocation3], 256  }
  0x35   :  { %629 = vsyncadd [#allocation3], 4294967040 }
  0x36   :  { %630 = dma.done.wait [#allocation6], 272  }
  0x37   :  { %631 = vsyncadd [#allocation6], 4294967024  ;;  %v639_v0 = vmov 0.0   ;;  %vm640_vm0 = vmmov 0   ;;  %v524_v1 = vld [vmem:[%s822_s1] sm:$0xff]   ;;  %v525_v2 = vld [vmem:[%s822_s1 + $0x8] sm:$0xff]  }
  0x38   :  { %468 = vmatprep.subr.bf16.mxu1 %v639_v0  ;;  %476 = vmatprep.mubr.msk.bf16.mxu1 %vm640_vm0, %v639_v0  ;;  %v526_v3 = vld [vmem:[%s822_s1 + $0x10] sm:$0xff]   ;;  %v527_v4 = vld [vmem:[%s822_s1 + $0x18] sm:$0xff]   ;;  %v73_v5 = vld [vmem:[%s821_s0] sm:$0xff]  ;;  %vm114_vm1 = vcmask 523264   ;;  %vm183_vm2 = vcmask 261120   ;;  %s641_s28 = smov [#allocation8]  }
  0x39   :  { %496 = vmatprep.subr.bf16.mxu0 %v639_v0  ;;  %512 = vmatprep.mubr.msk.bf16.mxu0 %vm640_vm0, %v639_v0  ;;  %v82_v6 = vpack.c.bf16 %v73_v5, %v73_v5  ;;  %v528_v7 = vld [vmem:[#allocation2] sm:$0xff]   ;;  %v529_v8 = vld [vmem:[#allocation2 + $0x8] sm:$0xff]   ;;  %v530_v16 = vld [vmem:[#allocation5] sm:$0xff]   ;;  %s415_s29 = sshll.u32 %s641_s28, 4  ;;  %s416_s29 = int_to_ptr.vmem [resolvable:$true] %s415_s29 }
  0x3a   :  { %469 = vmatpush3.bf16.msra.mxu1 %v524_v1  ;;  %v425_v9 = vld [vmem:[%s823_s2] ss:$0 sm:$0xff]  ;;  %v531_v18 = vld [vmem:[#allocation5 + $0x8] sm:$0xff]   ;;  %v533_v20 = vld [vmem:[%s828_s7 + $0x8] sm:$0xff]   ;;  %p611_p11 = scmp.lt.s32.totalorder %s416_s29, %s416_s29 }
  0x3b   :  { %470 = vmatprep.subr.bf16.mxu1 %v639_v0  ;;  %v532_v19 = vld [vmem:[%s828_s7] sm:$0xff]   ;;  %v534_v21 = vld [vmem:[%s828_s7 + $0x10] sm:$0xff]   ;;  %v535_v22 = vld [vmem:[%s828_s7 + $0x18] sm:$0xff]  }
  0x3c   :  { %497 = vmatpush3.bf16.msra.mxu0 %v532_v19  ;;  %v536_v23 = vld [vmem:[%s828_s7 + $0x20] sm:$0xff]   ;;  %v537_v24 = vld [vmem:[%s828_s7 + $0x28] sm:$0xff]   ;;  %v538_v33 = vld [vmem:[%s828_s7 + $0x30] sm:$0xff]  }
  0x3d   :  { %498 = vmatprep.subr.bf16.mxu0 %v639_v0  ;;  %v431_v25 = vld [vmem:[%s825_s4] ss:$0 sm:$0xff]  ;;  %v539_v34 = vld [vmem:[%s828_s7 + $0x38] sm:$0xff]   ;;  %s606_s7 = scalar_lea.vmem %s416_s29, 128 }
  0x3e   :  { %471 = vmatpush3.bf16.msra.mxu1 %v525_v2  ;;  %v435_v35 = vld [vmem:[#allocation7] ss:$0 sm:$0xff]  ;;  %p607_p10 = scmp.ne.s32.totalorder %s416_s29, %s606_s7  ;;  %p612_p12 = scmp.lt.s32.totalorder %s606_s7, %s606_s7 }
  0x3f   :  { %472 = vmatprep.subr.bf16.mxu1 %v639_v0  ;;  %v439_v43 = vld [vmem:[%s829_s8] ss:$0 sm:$0xff] }
  0x40   :  { %499 = vmatpush3.bf16.msra.mxu0 %v533_v20  ;;  %p613_p13 = por %p612_p12, %p611_p11 }
  0x41   :  { %500 = vmatprep.subr.bf16.mxu0 %v639_v0 }
  0x42   :  { %473 = vmatpush3.bf16.msra.mxu1 %v526_v3  ;;  %p614_p0 = pnand %p613_p13, %p607_p10 }
  0x43   :  { %474 = vmatprep.subr.bf16.mxu1 %v639_v0 }
  0x44   :  { %501 = vmatpush3.bf16.msra.mxu0 %v534_v21 }
  0x45   :  { %502 = vmatprep.subr.bf16.mxu0 %v639_v0 }
  0x46   :  { %475 = vmatpush3.bf16.msra.mxu1 %v527_v4 }
  0x47   :  { %480 = vmatprep.subr.bf16.mxu1 %v639_v0 }
  0x48   :  { %503 = vmatpush3.bf16.msra.mxu0 %v535_v22 }
  0x49   :  { %477 = vmatmul.mubr.msk.bf16.vlgmr.msra.gmra.mrb[0].mxu1 %vm114_vm1, %v82_v6  ;;  %504 = vmatprep.subr.bf16.mxu0 %v639_v0 }
  0x4a   :  { %481 = vmatpush3.bf16.msra.mxu1 %v528_v7  ;;  %484 = vmatprep.mubr.msk.bf16.mxu1 %vm640_vm0, %v639_v0 }
  0x4b   :  { %482 = vmatprep.subr.bf16.mxu1 %v639_v0 }
  0x4c   :  { %505 = vmatpush3.bf16.msra.mxu0 %v536_v23 }
  0x4d   :  { %506 = vmatprep.subr.bf16.mxu0 %v639_v0 }
  0x4e   :  { %483 = vmatpush3.bf16.msra.mxu1 %v529_v8 }
  0x4f   :  { %488 = vmatprep.subr.bf16.mxu1 %v639_v0 }
  0x50   :  { %507 = vmatpush3.bf16.msra.mxu0 %v537_v24 }
  0x51   :  { %508 = vmatprep.subr.bf16.mxu0 %v639_v0 }
  0x54   :  { %509 = vmatpush3.bf16.msra.mxu0 %v538_v33 }
  0x55   :  { %510 = vmatprep.subr.bf16.mxu0 %v639_v0 }
  0x58   :  { %511 = vmatpush3.bf16.msra.mxu0 %v539_v34 }
 0x11c   :  { %v152_v10 = vpop.f32.mrb[0].mxu1 }
 0x11d   :  { %v153_v11 = vadd.f32 %v425_v9, %v152_v10  ;;  %v478_v12 = vpop.f32.mrb[1].mxu1 }
 0x11e   :  { %v155_v13 = vpop.f32.mrb[2].mxu1 }
 0x11f   :  { %v158_v14 = vmax.f32 %v153_v11, 0.0  ;;  %v479_v15 = vpop.f32.mrb[3].mxu1 }
 0x121   :  { %v163_v17 = vpack.c.bf16 %v158_v14, %v158_v14 }
 0x123   :  { %485 = vmatmul.mubr.msk.bf16.vlgmr.msra.gmra.mrb[4].mxu1 %vm183_vm2, %v163_v17 }
 0x124   :  { %489 = vmatpush3.bf16.msra.mxu1 %v530_v16  ;;  %492 = vmatprep.mubr.msk.bf16.mxu1 %vm640_vm0, %v639_v0 }
 0x125   :  { %490 = vmatprep.subr.bf16.mxu1 %v639_v0 }
 0x128   :  { %491 = vmatpush3.bf16.msra.mxu1 %v531_v18 }
 0x1f6   :  { %v221_v26 = vpop.f32.mrb[4].mxu1 }
 0x1f7   :  { %v222_v27 = vadd.f32 %v431_v25, %v221_v26  ;;  %v486_v28 = vpop.f32.mrb[5].mxu1 }
 0x1f8   :  { %v224_v29 = vpop.f32.mrb[6].mxu1 }
 0x1f9   :  { %v227_v30 = vmax.f32 %v222_v27, 0.0  ;;  %v487_v31 = vpop.f32.mrb[7].mxu1 }
 0x1fb   :  { %v232_v32 = vpack.c.bf16 %v227_v30, %v227_v30 }
 0x1fd   :  { %493 = vmatmul.mubr.msk.bf16.vlgmr.msra.gmra.mrb[8].mxu1 %vm183_vm2, %v232_v32 }
 0x2d0   :  { %v289_v36 = vpop.f32.mrb[8].mxu1 }
 0x2d1   :  { %v290_v37 = vadd.f32 %v435_v35, %v289_v36  ;;  %v494_v38 = vpop.f32.mrb[9].mxu1 }
 0x2d2   :  { %v292_v39 = vpop.f32.mrb[10].mxu1 }
 0x2d3   :  { %v295_v40 = vmax.f32 %v290_v37, 0.0  ;;  %v495_v41 = vpop.f32.mrb[11].mxu1 }
 0x2d5   :  { %v312_v42 = vpack.c.bf16 %v295_v40, %v295_v40 }
 0x2d7   :  { %513 = vmatmul.mubr.bf16.vlgmr.msra.gmra.mrb[0].mxu0 %v312_v42 }
 0x3aa   :  { %v402_v44 = vpop.f32.mrb[0].mxu0 }
 0x3ab   :  { %v403_v45 = vadd.f32 %v439_v43, %v402_v44  ;;  %v514_v46 = vpop.f32.mrb[1].mxu0 }
 0x3ac   :  { %v405_v47 = vpop.f32.mrb[2].mxu0 }
 0x3ad   :  { %408 = vst [vmem:[#allocation8] sm:$0xff] %v403_v45  ;;  %v515_v48 = vpop.f32.mrb[3].mxu0 }
 0x3ae   :  { %617 = shalt.err (!%p614_p0)
}
 0x3af   :  { %s618_s8 = scalar_lea.hbm %s830_s9, 128 }
 0x3b0   :  { %p619_p1 = scmp.ne.s32.totalorder %s830_s9, %s618_s8  ;;  %p622_p2 = scmp.lt.u32.totalorder %s618_s8, %s830_s9 }
 0x3b2   :  { %p624_p3 = pnand %p622_p2, %p619_p1 }
 0x3b4   :  { %627 = shalt.err (!%p624_p3)
}
 0x3b5   :  { %418 = dma.vmem_to_hbm [thread:$0]  %s416_s29, 128, %s830_s9, [#allocation4]  }
 0x3b6   :  { %632 = dma.done.wait [#allocation4], 128  }
 0x3b7   :  { %633 = vsyncadd [#allocation4], 4294967168 }
 0x3b8   :  { %422 = vsyncpa [#allocation3], 1 }
 0x3b9   :  { %423 = vsyncpa [#allocation6], 1 }
 0x3ba   :  { %424 = vsyncpa [#allocation4], 1 }

</bundles_post_ra>
